<compile_context>
chip_gen: v5e
topology: v5e:2x2
jax: 0.10.0
libtpu: 0.0.40
codegen_flags: <defaults>
</compile_context>

<pallas_src>
import numpy as np
import jax
import jax.numpy as jnp
from jax.experimental import pallas as pl
from jax.experimental.pallas import tpu as pltpu

LANE = 128
MAX_TM = 2048          # 2048*128*4B = 1 MiB per f32 buffer
MIN_GRID_STEPS = 4     # keep >=4 grid steps when possible (v7x has 2 TCs)


# ----------------------------------------------------------------------------
# Schedule construction (init-time glue, plain numpy — matches make_beta_schedule)
# ----------------------------------------------------------------------------
def make_beta_schedule_linear(n_timestep, linear_start=1e-4, linear_end=2e-2):
    betas = (
        np.linspace(linear_start ** 0.5, linear_end ** 0.5, n_timestep, dtype=np.float64)
        ** 2
    )
    return betas


def build_schedule(timesteps=1000, linear_start=1e-4, linear_end=2e-2):
    betas = make_beta_schedule_linear(timesteps, linear_start, linear_end)
    alphas = 1.0 - betas
    alphas_cumprod = np.cumprod(alphas, axis=0)
    sched = {
        "betas": betas,
        "alphas_cumprod": alphas_cumprod,
        "alphas_cumprod_prev": np.append(1.0, alphas_cumprod[:-1]),
        "sqrt_alphas_cumprod": np.sqrt(alphas_cumprod),
        "sqrt_one_minus_alphas_cumprod": np.sqrt(1.0 - alphas_cumprod),
        "log_one_minus_alphas_cumprod": np.log(1.0 - alphas_cumprod),
        "sqrt_recip_alphas_cumprod": np.sqrt(1.0 / alphas_cumprod),
        "sqrt_recipm1_alphas_cumprod": np.sqrt(1.0 / alphas_cumprod - 1.0),
    }
    # register_buffer(..., to_torch(...)) casts to float32
    return {k: jnp.asarray(v, dtype=jnp.float32) for k, v in sched.items()}


# ----------------------------------------------------------------------------
# Pallas kernel: out = a[b] * x + s[b] * noise, streamed in (TM, 128) tiles
# ----------------------------------------------------------------------------
def _q_sample_kernel(a_ref, s_ref, x_ref, noise_ref, out_ref):
    # a_ref/s_ref: pre-gathered per-batch schedule scalars (SMEM, shape (B,)).
    # x_ref/noise_ref/out_ref: sublane-dense (TM, 128) VMEM tiles.
    b = pl.program_id(0)
    a = a_ref[b]
    s = s_ref[b]
    # TODO(synk): for bf16 inputs on v6e/v7x this could compute natively in
    # bf16 (cast a/s instead) to halve vreg pressure; kept f32 for portability
    # (v5e has no bf16 VALU) — the kernel is HBM-bound either way.
    out_ref[...] = (a * x_ref[...].astype(jnp.float32)
                    + s * noise_ref[...].astype(jnp.float32)).astype(out_ref.dtype)


# ----------------------------------------------------------------------------
# Tiling helpers
# ----------------------------------------------------------------------------
def _sublane_pack(dtype):
    # Native sublane packing: 8 rows for 32-bit, 16 for 16-bit, 32 for 8-bit.
    return max(8, 32 // jnp.dtype(dtype).itemsize)


def _choose_tm(R, B, dtype):
    """Sublane tile size: big blocks, dtype-aware packing, masked edge block."""
    pack = _sublane_pack(dtype)
    TM = min(R, MAX_TM)
    if TM < R:
        TM = max(pack, (TM // pack) * pack)   # MAX_TM is a multiple of 32 anyway
    # Keep the grid at >= MIN_GRID_STEPS total steps when data volume allows,
    # so v7x's two TensorCores both get work even at batch size 1.
    steps = B * ((R + TM - 1) // TM)
    if steps < MIN_GRID_STEPS:
        target_tiles = -(-MIN_GRID_STEPS // max(B, 1))      # ceil(4/B)
        cand = (R // target_tiles) // pack * pack
        if cand >= pack:
            TM = min(TM, cand)
    return max(TM, 1)


def _to_tiles(arr2d, B, N):
    """(B, N) -> (B, R, 128). Lane-pads only when N % 128 != 0."""
    n_pad = (-N) % LANE
    if n_pad:
        # TODO(synk): pad + trailing slice costs an extra HBM pass for
        # non-128-multiple trailing sizes; a masked-edge (B, N) tiling would
        # avoid it. Typical NCHW latents never hit this branch.
        arr2d = jnp.pad(arr2d, ((0, 0), (0, n_pad)))
    R = (N + n_pad) // LANE
    return arr2d.reshape(B, R, LANE), R


# ----------------------------------------------------------------------------
# Model wrapper
# ----------------------------------------------------------------------------
class AbstractLowScaleModelPallas:
    def __init__(self, noise_schedule_config=None):
        # Internal key for the noise=None path when the caller doesn't thread
        # an rng. NOTE: this split happens host-side; under jax.jit pass `rng`
        # explicitly so the seed is a traced value, not a baked-in constant.
        self._default_key = jax.random.PRNGKey(0)
        if noise_schedule_config is not None:
            self.register_schedule(**noise_schedule_config)

    def register_schedule(self, beta_schedule="linear", timesteps=1000,
                          linear_start=1e-4, linear_end=2e-2, cosine_s=8e-3):
        assert beta_schedule == "linear", "only 'linear' schedule implemented here"
        sched = build_schedule(timesteps, linear_start, linear_end)
        self.num_timesteps = int(timesteps)
        self.linear_start = linear_start
        self.linear_end = linear_end
        for k, v in sched.items():
            setattr(self, k, v)

    # forward(x) -> (x, None): identity pass-through; no kernel, no HBM copy.
    def forward(self, x):
        return x, None

    def __call__(self, x):
        return self.forward(x)

    def decode(self, x):
        return x

    # q_sample: scalar-prefetched per-batch schedule coefficients + fused
    # streaming multiply-add over sublane-dense (TM, 128) tiles.
    def q_sample(self, x_start, t, noise=None, rng=None):
        B = x_start.shape[0]
        N = int(np.prod(x_start.shape[1:]))
        dtype = x_start.dtype

        if noise is None:
            # torch.randn_like equivalent (wrapper-side; keeps the kernel a pure
            # mem-bound FMA that lowers on every backend, incl. interpret mode).
            if rng is None:
                self._default_key, rng = jax.random.split(self._default_key)
            noise = jax.random.normal(rng, x_start.shape, dtype=dtype)

        x3, R = _to_tiles(x_start.reshape(B, N), B, N)
        n3, _ = _to_tiles(noise.reshape(B, N).astype(dtype), B, N)

        TM = _choose_tm(R, B, dtype)
        grid = (B, (R + TM - 1) // TM)

        t32 = jnp.asarray(t).astype(jnp.int32)
        # Pre-gather the two schedule scalars (cheap XLA gather of B elements)
        # instead of prefetching the full 1000-entry tables into SMEM.
        a = self.sqrt_alphas_cumprod[t32]                 # (B,) f32
        s = self.sqrt_one_minus_alphas_cumprod[t32]       # (B,) f32

        itemsize = jnp.dtype(dtype).itemsize
        cost = pl.CostEstimate(
            flops=3 * B * R * LANE,
            transcendentals=0,
            bytes_accessed=3 * B * R * LANE * itemsize,   # x + noise + out
        )

        block = (None, TM, LANE)
        out3 = pl.pallas_call(
            _q_sample_kernel,
            out_shape=jax.ShapeDtypeStruct((B, R, LANE), dtype),
            grid_spec=pltpu.PrefetchScalarGridSpec(
                num_scalar_prefetch=2,    # a, s
                grid=grid,
                in_specs=[pl.BlockSpec(block, lambda b, j, *_: (b, j, 0)),
                          pl.BlockSpec(block, lambda b, j, *_: (b, j, 0))],
                out_specs=pl.BlockSpec(block, lambda b, j, *_: (b, j, 0)),
            ),
            compiler_params=pltpu.CompilerParams(
                dimension_semantics=("parallel", "parallel")),
            cost_estimate=cost,
        )(a, s, x3, n3)

        out = out3.reshape(B, R * LANE)
        if R * LANE != N:
            out = out[:, :N]
        return out.reshape(x_start.shape)


# ----------------------------------------------------------------------------
# Main
# ----------------------------------------------------------------------------
if __name__ == "__main__":
    key = jax.random.PRNGKey(0)
    kx, kn, kt, kr, kr2 = jax.random.split(key, 5)

    B, C, H, W = 2, 4, 16, 16          # NCHW, same convention as the PyTorch module
    TIMESTEPS = 1000

    model = AbstractLowScaleModelPallas(
        noise_schedule_config=dict(beta_schedule="linear", timesteps=TIMESTEPS,
                                   linear_start=1e-4, linear_end=2e-2))

    x = jax.random.normal(kx, (B, C, H, W), dtype=jnp.float32)
    noise = jax.random.normal(kn, (B, C, H, W), dtype=jnp.float32)
    t = jax.random.randint(kt, (B,), 0, TIMESTEPS, dtype=jnp.int32)

    # forward: (x, None) — pure pass-through, no copy
    fwd_out, none_out = model(x)
    fwd_out = jax.block_until_ready(fwd_out)
    assert none_out is None
    np.testing.assert_allclose(np.asarray(fwd_out), np.asarray(x), rtol=0, atol=0)

    # q_sample with explicit noise — validate against pure-JAX reference
    out = model.q_sample(x, t, noise)
    out = jax.block_until_ready(out)
    a_ref = model.sqrt_alphas_cumprod[t].reshape(B, 1, 1, 1)
    s_ref = model.sqrt_one_minus_alphas_cumprod[t].reshape(B, 1, 1, 1)
    ref = a_ref * x + s_ref * noise
    np.testing.assert_allclose(np.asarray(out), np.asarray(ref), rtol=1e-6, atol=1e-6)

    # q_sample with default noise (wrapper-generated Gaussian) — validate
    # against the same rng, and check distinct keys give distinct outputs.
    out_a = jax.block_until_ready(model.q_sample(x, t, noise=None, rng=kr))
    noise_a = jax.random.normal(kr, x.shape, dtype=x.dtype)
    ref_a = a_ref * x + s_ref * noise_a
    np.testing.assert_allclose(np.asarray(out_a), np.asarray(ref_a),
                               rtol=1e-6, atol=1e-6)
    out_b = jax.block_until_ready(model.q_sample(x, t, noise=None, rng=kr2))
    assert out_a.shape == x.shape
    assert bool(jnp.all(jnp.isfinite(out_a)))
    assert not bool(jnp.allclose(out_a, out_b))

    print("KERNEL_OK")
</pallas_src>

<mosaic_0001>
module attributes {stable_mosaic.version = 11 : i64} {
  func.func @_q_sample_kernel(%arg0: i32, %arg1: i32, %arg2: memref<2xf32, #tpu.memory_space<smem>>, %arg3: memref<2xf32, #tpu.memory_space<smem>>, %arg4: memref<1x8x128xf32, #tpu.memory_space<vmem>>, %arg5: memref<1x8x128xf32, #tpu.memory_space<vmem>>, %arg6: memref<1x8x128xf32, #tpu.memory_space<vmem>>) attributes {dimension_semantics = [#tpu.dimension_semantics<parallel>, #tpu.dimension_semantics<parallel>], iteration_bounds = array<i64: 2, 1>, scalar_prefetch = 2 : i64, scratch_operands = 0 : i64, tpu.core_type = #tpu.core_type<tc>, window_params = [{transform_indices = @transform_0, window_bounds = array<i64: 1, 8, 128>}, {transform_indices = @transform_1, window_bounds = array<i64: 1, 8, 128>}, {transform_indices = @transform_2, window_bounds = array<i64: 1, 8, 128>}]} {
    %0 = arith.index_cast %arg0 : i32 to index
    %1 = memref.load %arg2[%0] : memref<2xf32, #tpu.memory_space<smem>>
    %2 = arith.index_cast %arg0 : i32 to index
    %3 = memref.load %arg3[%2] : memref<2xf32, #tpu.memory_space<smem>>
    %c0 = arith.constant 0 : index
    %c0_0 = arith.constant 0 : index
    %c0_1 = arith.constant 0 : index
    %4 = vector.load %arg4[%c0, %c0_0, %c0_1] : memref<1x8x128xf32, #tpu.memory_space<vmem>>, vector<1x8x128xf32>
    %5 = vector.shape_cast %4 : vector<1x8x128xf32> to vector<8x128xf32>
    %6 = vector.broadcast %1 : f32 to vector<8x128xf32>
    %7 = arith.mulf %6, %5 : vector<8x128xf32>
    %c0_2 = arith.constant 0 : index
    %c0_3 = arith.constant 0 : index
    %c0_4 = arith.constant 0 : index
    %8 = vector.load %arg5[%c0_2, %c0_3, %c0_4] : memref<1x8x128xf32, #tpu.memory_space<vmem>>, vector<1x8x128xf32>
    %9 = vector.shape_cast %8 : vector<1x8x128xf32> to vector<8x128xf32>
    %10 = vector.broadcast %3 : f32 to vector<8x128xf32>
    %11 = arith.mulf %10, %9 : vector<8x128xf32>
    %12 = arith.addf %7, %11 : vector<8x128xf32>
    %c0_5 = arith.constant 0 : index
    %c0_6 = arith.constant 0 : index
    %c0_7 = arith.constant 0 : index
    %13 = vector.load %arg6[%c0_5, %c0_6, %c0_7] : memref<1x8x128xf32, #tpu.memory_space<vmem>>, vector<1x8x128xf32>
    %14 = vector.shape_cast %13 : vector<1x8x128xf32> to vector<8x128xf32>
    %15 = vector.shape_cast %12 : vector<8x128xf32> to vector<1x8x128xf32>
    tpu.vector_store %arg6[%c0_5, %c0_6, %c0_7], %15 {strides = array<i32>} : memref<1x8x128xf32, #tpu.memory_space<vmem>>, vector<1x8x128xf32>,
    return
  }
  func.func @transform_0(%arg0: i32, %arg1: i32, %arg2: memref<2xf32, #tpu.memory_space<smem>>, %arg3: memref<2xf32, #tpu.memory_space<smem>>) -> (i32, i32, i32) {
    %c0_i32 = arith.constant 0 : i32
    %c0_i32_0 = arith.constant 0 : i32
    return %arg0, %arg1, %c0_i32 : i32, i32, i32
  }
  func.func @transform_1(%arg0: i32, %arg1: i32, %arg2: memref<2xf32, #tpu.memory_space<smem>>, %arg3: memref<2xf32, #tpu.memory_space<smem>>) -> (i32, i32, i32) {
    %c0_i32 = arith.constant 0 : i32
    %c0_i32_0 = arith.constant 0 : i32
    return %arg0, %arg1, %c0_i32 : i32, i32, i32
  }
  func.func @transform_2(%arg0: i32, %arg1: i32, %arg2: memref<2xf32, #tpu.memory_space<smem>>, %arg3: memref<2xf32, #tpu.memory_space<smem>>) -> (i32, i32, i32) {
    %c0_i32 = arith.constant 0 : i32
    %c0_i32_0 = arith.constant 0 : i32
    return %arg0, %arg1, %c0_i32 : i32, i32, i32
  }
}

</mosaic_0001>

<bundles_post_ra>
// kernel: tpu_custom_call.1
= control target key start
LH: loop header
LB: loop body
LE: loop exit
PB: predicated region body
PF: predicated region fallthrough
CT: control target
= control target key end

     0   :  { %s625_s21 = smov [#allocation3]   ;;  %s626_s22 = smov [#allocation4]   ;;  %s788_s0 = inlined_call_operand.hbm [shape: f32[2], index: 0, kind: input, shape index: {}]   ;;  %s789_s2 = inlined_call_operand.hbm [shape: f32[2,8,128], index: 2, kind: input, shape index: {}]   ;;  %s790_s3 = inlined_call_operand.hbm [shape: f32[2,8,128], index: 3, kind: input, shape index: {}]   ;;  %s791_s4 = inlined_call_operand.hbm [shape: f32[2,8,128], index: 4, kind: output, shape index: {}]   ;;  %s792_s1 = inlined_call_operand.hbm [shape: f32[2], index: 1, kind: input, shape index: {}]  }
   0x1   :  { %s10_s17 = sshll.u32 %s788_s0, 4  ;;  %s15_s20 = sshll.u32 %s792_s1, 4  ;;  %s11_s17 = int_to_ptr.hbm [resolvable:$true] %s10_s17  ;;  %s16_s20 = int_to_ptr.hbm [resolvable:$true] %s15_s20 }
   0x2   :  { %13 = dma.hbm_to_smem %s11_s17, 16, %s625_s21, [#allocation2] }
   0x3   :  { %18 = dma.hbm_to_smem %s16_s20, 16, %s626_s22, [#allocation2] }
   0x4   :  { %587 = dma.done.wait [#allocation2], 32 }
   0x5   :  { %588 = vsyncadd [#allocation2], 4294967264 }
   0x6   :  { %21 = sfence }
   0x7   :  { %22 = vsyncpa [#allocation6], 0 }
   0x8   :  { %24 = vsyncpa [#allocation6 + $0x1], 0 }
   0x9   :  { %25 = vsyncpa [#allocation9], 0 }
   0xa   :  { %27 = vsyncpa [#allocation9 + $0x1], 0 }
   0xb   :  { %28 = vsyncpa [#allocation7], 0 }
   0xc   :  { %30 = vsyncpa [#allocation7 + $0x1], 0  ;;  %s658_s0 = smov 0   ;;  %s660_s23 = smov 0  }
   0xd   :  { %s662_s1 = smov 0   ;;  %s664_s24 = smov 0  }
   0xe   :  { %s666_s25 = smov 0   ;;  %s668_s26 = smov 0  }
   0xf LB: > { %s366_s27 = sadd.s32 4294967295, %s623_s26   ;;  %s367_s28 = sadd.s32 4294967294, %s623_s26   ;;  %s623_s26 = sphi %s668_s26, %s36_s26   ;;  %s619_s25 = sphi %s666_s25, %s801_s25   ;;  %s615_s24 = sphi %s664_s24, %s800_s24   ;;  %s611_s1 = sphi %s662_s1, %s799_s1   ;;  %s607_s23 = sphi %s660_s23, %s798_s23   ;;  %s603_s0 = sphi %s658_s0, %s797_s0  }
  0x10   : > { %s48_s29 = sadd.s32 1, %s619_s25  ;;  %s57_s30 = sadd.s32 1, %s611_s1 }
  0x11   : > { %p50_p0 = scmp.ge.s32.totalorder %s48_s29, 2  ;;  %p64_p1 = scmp.ne.s32.totalorder %s611_s1, %s607_s23 }
  0x12   : > { %p65_p2 = scmp.eq.s32.totalorder %s623_s26, 0  ;;  %p70_p3 = scmp.ne.s32.totalorder %s607_s23, %s603_s0 }
  0x13   : > { %s803_s29 = smov (%p50_p0, %s48_s29), 0  ;;  %p71_p5 = scmp.eq.s32.totalorder %s366_s27, 0 }
  0x14   : > { %p699_p4 = por %p65_p2, %p64_p1  ;;  %s52_s6 = ssub.s32 %s619_s25, %s803_s29 }
  0x15   : > { %p124_p6 = scmp.eq.s32.totalorder %s366_s27, 1  ;;  %p55_p7 = scmp.eq.s32.totalorder %s52_s6, 0 }
  0x16   : > { %p705_p8 = por %p71_p5, %p70_p3  ;;  %p130_p10 = scmp.eq.s32.totalorder %s367_s28, 1 }
  0x17   : > { %p709_p9 = por %p124_p6, %p64_p1  ;;  %p369_p12 = scmp.ge.s32.totalorder %s623_s26, 2 }
  0x18   : > { %s714_s9 = scalar_select %p55_p7, %s611_s1, %s57_s30  }
  0x19   : > { %p716_p11 = por %p130_p10, %p70_p3  ;;  %p399_p13 = scmp.lt.s32.totalorder %s623_s26, 2 }
  0x1a   : > { %s150_s11 = sand.u32 1, %s611_s1   ;;  %s371_s13 = sshll.u32 %s619_s25, 3 }
  0x1b   : > { %s370_s12 = sshll.u32 %s150_s11, 3  ;;  %s159_s16 = scalar_lea.hbm %s789_s2, %s371_s13 }
  0x1c   : > { %s154_s17 = scalar_lea.vmem [#allocation5], %s370_s12  ;;  %s161_s19 = sshll.u32 %s159_s16, 4  ;;  %s162_s19 = int_to_ptr.hbm [resolvable:$true] %s161_s19 }
  0x1d   : > { %s163_s18 = sshll.u32 %s154_s17, 4  ;;  %p389_p0 = pnand %p399_p13, %p699_p4  ;;  %s164_s18 = int_to_ptr.vmem [resolvable:$true] %s163_s18 }
  0x1e   : > { %p374_p1 = scmp.ge.s32.totalorder %s623_s26, 1  ;;  %p188_p2 = scmp.lt.s32.totalorder %s623_s26, 3 }
  0x1f   : > { %s151_s20 = scalar_lea.sflag [#allocation6], %s150_s11  ;;  %s179_s27 = scalar_lea.hbm %s790_s3, %s371_s13 }
  0x20   : > { %391 = dma.hbm_to_vmem [thread:$0]  (!%p389_p0), %s162_s19, 128, %s164_s18, %s151_s20  }
  0x21   : > { %p189_p3 = pnand %p374_p1, %p188_p2  ;;  %s174_s28 = scalar_lea.vmem [#allocation8], %s370_s12 }
  0x22   : > { %s183_s30 = sshll.u32 %s174_s28, 4  ;;  %s181_s6 = sshll.u32 %s179_s27, 4  ;;  %s184_s30 = int_to_ptr.vmem [resolvable:$true] %s183_s30  ;;  %s182_s6 = int_to_ptr.hbm [resolvable:$true] %s181_s6 }
  0x23   : > { %s171_s14 = scalar_lea.sflag [#allocation9], %s150_s11  ;;  %192 = sbr.rel (%p189_p3) target bundleno = 59 (0x3b), region = 28 }
  0x24   : > { %394 = dma.hbm_to_vmem [thread:$0]  (!%p389_p0), %s182_s6, 128, %s184_s30, %s171_s14  }
  0x25   : > { %s735_s5 = sand.u32 (!%p189_p3), 1, %s607_s23  }
  0x26   : > { %s375_s15 = sshll.u32 (!%p189_p3), %s735_s5, 3  ;;  %s195_s16 = scalar_lea.sflag (!%p189_p3), [#allocation6], %s735_s5 }
  0x27   : > { %s198_s17 = scalar_lea.vmem (!%p189_p3), [#allocation5], %s375_s15 }
  0x28   : > { %590 = dma.done.wait (%p705_p8), %s195_s16, 128  }
  0x29   : > { %592 = vsyncadd (%p705_p8), %s195_s16, 4294967168  ;;  %s205_s12 = scalar_lea.sflag [#allocation9], %s735_s5  ;;  %s208_s11 = scalar_lea.vmem [#allocation8], %s375_s15 }
  0x2a   : > { %594 = dma.done.wait (%p705_p8), %s205_s12, 128  }
  0x2b   : > { %596 = vsyncadd (%p705_p8), %s205_s12, 4294967168  ;;  %s235_s13 = sld [smem:[#allocation3 + %s615_s24]]  ;;  %s379_s19 = sshll.u32 %s615_s24, 3  ;;  %v237_v0 = vld [vmem:[%s198_s17] sm:$0xff]  ;;  %v240_v2 = vld [vmem:[%s208_s11] sm:$0xff] }
  0x2c   : > { %s236_s18 = sld [smem:[#allocation4 + %s615_s24]]  ;;  %s257_s22 = scalar_lea.hbm %s791_s4, %s379_s19 }
  0x2d   : > { %s234_s27 = scalar_lea.vmem [#allocation10], %s375_s15  ;;  %s261_s28 = sshll.u32 %s257_s22, 4  ;;  %s262_s28 = int_to_ptr.hbm [resolvable:$true] %s261_s28 }
  0x2e   : > { %s259_s7 = sshll.u32 %s234_s27, 4  ;;  %s246_s30 = scalar_lea.sflag [#allocation7], %s735_s5  ;;  %s260_s7 = int_to_ptr.vmem [resolvable:$true] %s259_s7 }
  0x2f   : > { %s549_s24 = sshra.s32 %s262_s28, 4  ;;  %s555_s17 = scalar_lea.hbm %s791_s4, 16  ;;  %s550_s24 = int_to_ptr.hbm [resolvable:$true] %s549_s24 }
  0x30   : > { %s551_s6 = scalar_lea.hbm %s550_s24, 8  ;;  %p556_p7 = scmp.lt.s32.totalorder %s550_s24, %s791_s4 }
  0x31   : > { %v238_v1 = vstv %s235_s13  ;;  %p552_p4 = scmp.ne.s32.totalorder %s550_s24, %s551_s6  ;;  %p557_p8 = scmp.lt.s32.totalorder %s555_s17, %s551_s6 }
  0x32   : > { %v239_v3 = vmul.f32 %v238_v1, %v237_v0  ;;  %v241_v4 = vstv %s236_s18 }
  0x33   : > { %v242_v5 = vmul.f32 %v241_v4, %v240_v2  ;;  %p553_p5 = pnand %p552_p4, %p709_p9  ;;  %p558_p10 = por %p557_p8, %p556_p7 }
  0x35   : > { %v243_v6 = vadd.f32 %v242_v5, %v239_v3  ;;  %p554_p6 = pneg %p553_p5 }
  0x37   : > { %244 = vst [vmem:[%s234_s27] sm:$0xff] %v243_v6  ;;  %p559_p13 = pnand %p558_p10, %p554_p6 }
  0x39   : > { %562 = shalt.err (!%p559_p13)
}
  0x3a   : > { %386 = dma.vmem_to_hbm [thread:$0]  (%p709_p9), %s260_s7, 128, %s262_s28, %s246_s30  }
  0x3b PF: > { %s273_s5 = sand.u32 1, %s603_s0   ;;  %p396_p0 = pnand %p369_p12, %p716_p11 }
  0x3c   : > { %s274_s11 = scalar_lea.sflag [#allocation7], %s273_s5 }
  0x3d   : > { %p397_p1 = pneg %p396_p0 }
  0x3f   : > { %598 = dma.done.wait (%p397_p1), %s274_s11, 128  }
  0x40   : > { %600 = vsyncadd (%p397_p1), %s274_s11, 4294967168  ;;  %s36_s26 = sadd.s32 1, %s623_s26   ;;  %s797_s0 = smov %s607_s23 }
  0x41   : > { %p33_p2 = scmp.ge.s32.totalorder %s36_s26, 4   ;;  %s798_s23 = smov %s611_s1 }
  0x42   : > { %s799_s1 = smov %s714_s9  ;;  %s800_s24 = smov %s619_s25 }
  0x43   : > { %s801_s25 = smov %s803_s29  ;;  %35 = sbr.rel (!%p33_p2) target bundleno = 15 (0xf), region = 86 }
  0x48   :  { %280 = vsyncpa [#allocation6], 1 }
  0x49   :  { %282 = vsyncpa [#allocation6 + $0x1], 1 }
  0x4a   :  { %283 = vsyncpa [#allocation9], 1 }
  0x4b   :  { %285 = vsyncpa [#allocation9 + $0x1], 1 }
  0x4c   :  { %286 = vsyncpa [#allocation7], 1 }
  0x4d   :  { %288 = vsyncpa [#allocation7 + $0x1], 1 }

</bundles_post_ra>
